<compile_context>
chip_gen: v5e
topology: v5e:2x2
jax: 0.10.0
libtpu: 0.0.40
codegen_flags: <defaults>
</compile_context>

<pallas_src>
import math
import functools

import jax
import jax.numpy as jnp
from jax import lax
from jax.experimental import pallas as pl
from jax.experimental.pallas import tpu as pltpu


def _global_graph_kernel(*refs, num_heads, head_size, has_mask, compute_dtype):
    """One grid step: (Bt, S, H) batch tile -> (Bt, all_head) max-pooled attention."""
    if has_mask:
        x_ref, mask_ref, w_ref, b_ref, out_ref = refs
    else:
        x_ref, w_ref, b_ref, out_ref = refs
        mask_ref = None

    bt, seq, hidden = x_ref.shape
    all_head = num_heads * head_size
    use_lp = compute_dtype != jnp.float32

    # ---- Fused QKV projection: one MXU matmul, M = Bt*S, N = 3*all_head. ----
    x2 = x_ref[...].reshape(bt * seq, hidden)
    w = w_ref[...]
    if use_lp:
        x2 = x2.astype(compute_dtype)
        w = w.astype(compute_dtype)
    qkv = jnp.dot(x2, w, preferred_element_type=jnp.float32) + b_ref[0]
    qkv = qkv.reshape(bt, seq, 3 * all_head)                      # f32

    if has_mask:
        # get_extended_attention_mask: 1 -> 0, 0 -> -1e7  (mask shipped as bf16)
        ext_mask = (1.0 - mask_ref[...].astype(jnp.float32)) * -10000000.0  # (Bt,S,S)

    scale = 1.0 / math.sqrt(head_size)

    for h in range(num_heads):                     # static unroll; num_heads is small
        q = qkv[:, :, h * head_size:(h + 1) * head_size] * scale
        k = qkv[:, :, all_head + h * head_size: all_head + (h + 1) * head_size]
        v = qkv[:, :, 2 * all_head + h * head_size: 2 * all_head + (h + 1) * head_size]
        if use_lp:
            q = q.astype(compute_dtype)
            k = k.astype(compute_dtype)
            v = v.astype(compute_dtype)

        # Batched q @ k^T without materializing a transpose:
        # contract last dims, batch over the tile-batch axis.
        scores = lax.dot_general(q, k, (((2,), (2,)), ((0,), (0,))),
                                 preferred_element_type=jnp.float32)   # (Bt, S, S)
        if has_mask:
            scores = scores + ext_mask

        m = jnp.max(scores, axis=-1, keepdims=True)
        p = jnp.exp(scores - m)
        denom = jnp.sum(p, axis=-1, keepdims=True)
        probs = p * pl.reciprocal(denom, approx=True)              # softmax(dim=-1)

        pv = probs.astype(compute_dtype) if use_lp else probs
        ctx = lax.dot_general(pv, v, (((2,), (1,)), ((0,), (0,))),
                              preferred_element_type=jnp.float32)      # (Bt, S, d)

        # torch.max(context_layer, dim=1)[0] restricted to this head's lanes;
        # direct slice store -> no (S, all_head) concatenate is ever built.
        out_ref[:, h * head_size:(h + 1) * head_size] = (
            jnp.max(ctx, axis=1).astype(out_ref.dtype))


def _pick_batch_tile(B, S, H, all_head, has_mask,
                     budget_bytes=40 * 1024 * 1024):
    """Largest divisor of B whose per-step VMEM footprint fits the budget."""
    weight_bytes = 2 * (H * 3 * all_head * 4 + 3 * all_head * 4)   # double-buffered
    per_b = 2 * S * H * 4                                          # x block (dbl buf)
    if has_mask:
        per_b += 2 * S * S * 2 + S * S * 4                         # bf16 mask + f32 ext
    per_b += S * 3 * all_head * 4                                  # qkv
    per_b += 3 * S * S * 4                                         # scores / p / probs
    per_b += 2 * all_head * 4                                      # out block
    for bt in range(B, 0, -1):
        if B % bt == 0 and bt * per_b + weight_bytes <= budget_bytes:
            return bt
    return 1


def global_graph_forward(hidden_states, attention_mask,
                         wq, bq, wk, bk, wv, bv,
                         *, num_heads, head_size,
                         compute_dtype=jnp.float32, batch_tile=None):
    """hidden_states: (B, S, H) f32; attention_mask: (B, S, S) with 1/0 or None.

    compute_dtype=jnp.bfloat16 casts only the MXU operands (f32 accumulation,
    f32 softmax math) — recommended on v6e / v7x.
    """
    B, S, H = hidden_states.shape
    all_head = num_heads * head_size
    has_mask = attention_mask is not None

    # Fuse the three projections into one (H, 3*all_head) weight + (1, 3*all_head) bias.
    w_qkv = jnp.concatenate([wq, wk, wv], axis=1)
    b_qkv = jnp.concatenate([bq, bk, bv]).reshape(1, 3 * all_head)

    Bt = batch_tile if batch_tile is not None else _pick_batch_tile(
        B, S, H, all_head, has_mask)
    grid = (B // Bt,)

    kernel = functools.partial(_global_graph_kernel,
                               num_heads=num_heads, head_size=head_size,
                               has_mask=has_mask, compute_dtype=compute_dtype)

    in_specs = [pl.BlockSpec((Bt, S, H), lambda b: (b, 0, 0))]         # hidden_states
    args = [hidden_states]
    if has_mask:
        in_specs.append(pl.BlockSpec((Bt, S, S), lambda b: (b, 0, 0)))  # mask (bf16)
        args.append(attention_mask.astype(jnp.bfloat16))
    in_specs += [pl.BlockSpec((H, 3 * all_head), lambda b: (0, 0)),     # fused W
                 pl.BlockSpec((1, 3 * all_head), lambda b: (0, 0))]     # fused b
    args += [w_qkv, b_qkv]

    return pl.pallas_call(
        kernel,
        out_shape=jax.ShapeDtypeStruct((B, all_head), jnp.float32),
        grid_spec=pltpu.PrefetchScalarGridSpec(
            num_scalar_prefetch=0,
            grid=grid,
            in_specs=in_specs,
            out_specs=pl.BlockSpec((Bt, all_head), lambda b: (b, 0)),
        ),
        compiler_params=pltpu.CompilerParams(
            dimension_semantics=("parallel",),
            # Above v5e's 16 MiB scoped default, below v7x's 64 MiB physical.
            vmem_limit_bytes=48 * 1024 * 1024),
    )(*args)


def _reference(hidden_states, attention_mask, wq, bq, wk, bk, wv, bv,
               *, num_heads, head_size):
    """Pure-JAX reference mirroring the PyTorch module."""
    B, S, H = hidden_states.shape
    q = hidden_states @ wq + bq
    k = hidden_states @ wk + bk
    v = hidden_states @ wv + bv

    def split(x):  # (B, S, nH*d) -> (B, nH, S, d)
        return x.reshape(B, S, num_heads, head_size).transpose(0, 2, 1, 3)

    qh, kh, vh = split(q), split(k), split(v)
    scores = jnp.einsum("bhqd,bhkd->bhqk", qh / math.sqrt(head_size), kh)
    if attention_mask is not None:
        ext = (1.0 - attention_mask[:, None, :, :]) * -10000000.0
        scores = scores + ext
    probs = jax.nn.softmax(scores, axis=-1)
    ctx = jnp.einsum("bhqk,bhkd->bhqd", probs, vh)
    ctx = ctx.transpose(0, 2, 1, 3).reshape(B, S, num_heads * head_size)
    return jnp.max(ctx, axis=1)


if __name__ == "__main__":
    # Small shapes consistent with the module.
    B, S, hidden_size = 2, 8, 32
    num_heads = 2
    head_size = hidden_size // num_heads          # attention_head_size
    all_head = num_heads * head_size

    key = jax.random.PRNGKey(0)
    k_x, k_m, kq, kbq, kk, kbk, kv, kbv = jax.random.split(key, 8)

    hidden_states = jax.random.normal(k_x, (B, S, hidden_size), dtype=jnp.float32)
    # attention_mask: 1 = attend, 0 = masked (train path)
    attention_mask = (jax.random.uniform(k_m, (B, S, S)) > 0.2).astype(jnp.float32)

    # nn.Linear-like init, stored as (in, out) = torch W.T
    lim = 1.0 / math.sqrt(hidden_size)
    wq = jax.random.uniform(kq, (hidden_size, all_head), minval=-lim, maxval=lim, dtype=jnp.float32)
    bq = jax.random.uniform(kbq, (all_head,), minval=-lim, maxval=lim, dtype=jnp.float32)
    wk = jax.random.uniform(kk, (hidden_size, all_head), minval=-lim, maxval=lim, dtype=jnp.float32)
    bk = jax.random.uniform(kbk, (all_head,), minval=-lim, maxval=lim, dtype=jnp.float32)
    wv = jax.random.uniform(kv, (hidden_size, all_head), minval=-lim, maxval=lim, dtype=jnp.float32)
    bv = jax.random.uniform(kbv, (all_head,), minval=-lim, maxval=lim, dtype=jnp.float32)

    ref = _reference(hidden_states, attention_mask, wq, bq, wk, bk, wv, bv,
                     num_heads=num_heads, head_size=head_size)
    ref_inf = _reference(hidden_states, None, wq, bq, wk, bk, wv, bv,
                         num_heads=num_heads, head_size=head_size)

    # Train-path semantics (with mask), f32 MXU operands.
    out = global_graph_forward(hidden_states, attention_mask,
                               wq, bq, wk, bk, wv, bv,
                               num_heads=num_heads, head_size=head_size)
    out = jax.block_until_ready(out)

    # Inference-path semantics (no mask, mask-free kernel variant).
    out_inf = global_graph_forward(hidden_states, None,
                                   wq, bq, wk, bk, wv, bv,
                                   num_heads=num_heads, head_size=head_size)
    out_inf = jax.block_until_ready(out_inf)

    # bf16 MXU-operand variant (v6e/v7x optimization), f32 accumulation.
    out_bf16 = global_graph_forward(hidden_states, attention_mask,
                                    wq, bq, wk, bk, wv, bv,
                                    num_heads=num_heads, head_size=head_size,
                                    compute_dtype=jnp.bfloat16)
    out_bf16 = jax.block_until_ready(out_bf16)

    assert out.shape == (B, all_head)
    # f32 paths: only approximation is pl.reciprocal(approx=True) in the softmax.
    assert jnp.allclose(out, ref, atol=5e-3, rtol=5e-3)
    assert jnp.allclose(out_inf, ref_inf, atol=5e-3, rtol=5e-3)
    # bf16 MXU operands: looser tolerance.
    assert jnp.allclose(out_bf16, ref, atol=5e-2, rtol=5e-2)

    print("KERNEL_OK")
</pallas_src>

<mosaic_0001>
module attributes {stable_mosaic.version = 11 : i64} {
  func.func @_global_graph_kernel(%arg0: i32, %arg1: memref<2x8x32xf32, #tpu.memory_space<vmem>>, %arg2: memref<2x8x8xbf16, #tpu.memory_space<vmem>>, %arg3: memref<32x96xf32, #tpu.memory_space<vmem>>, %arg4: memref<1x96xf32, #tpu.memory_space<vmem>>, %arg5: memref<2x32xf32, #tpu.memory_space<vmem>>) attributes {dimension_semantics = [#tpu.dimension_semantics<parallel>], iteration_bounds = array<i64: 1>, scalar_prefetch = 0 : i64, scratch_operands = 0 : i64, tpu.core_type = #tpu.core_type<tc>, window_params = [{transform_indices = @transform_0, window_bounds = array<i64: 2, 8, 32>}, {transform_indices = @transform_1, window_bounds = array<i64: 2, 8, 8>}, {pipeline_mode = #tpu.pipeline_mode<synchronous>, transform_indices = @transform_2, window_bounds = array<i64: 32, 96>}, {pipeline_mode = #tpu.pipeline_mode<synchronous>, transform_indices = @transform_3, window_bounds = array<i64: 1, 96>}, {transform_indices = @transform_4, window_bounds = array<i64: 2, 32>}]} {
    %c0 = arith.constant 0 : index
    %c0_0 = arith.constant 0 : index
    %c0_1 = arith.constant 0 : index
    %0 = vector.load %arg1[%c0, %c0_0, %c0_1] : memref<2x8x32xf32, #tpu.memory_space<vmem>>, vector<2x8x32xf32>
    %1 = vector.shape_cast %0 : vector<2x8x32xf32> to vector<16x32xf32>
    %c0_2 = arith.constant 0 : index
    %c0_3 = arith.constant 0 : index
    %2 = vector.load %arg3[%c0_2, %c0_3] : memref<32x96xf32, #tpu.memory_space<vmem>>, vector<32x96xf32>
    %cst = arith.constant dense<0.000000e+00> : vector<16x96xf32>
    %3 = tpu.matmul %1, %2, %cst {dimension_numbers = #tpu.dot_dimension_numbers<[1], [0], [0], [1], [0, 0, 1, 1], [], []>} : vector<16x32xf32>, vector<32x96xf32>, vector<16x96xf32> -> vector<16x96xf32>
    %c0_4 = arith.constant 0 : index
    %c0_5 = arith.constant 0 : index
    %4 = vector.load %arg4[%c0_4, %c0_5] : memref<1x96xf32, #tpu.memory_space<vmem>>, vector<1x96xf32>
    %5 = vector.shape_cast %4 : vector<1x96xf32> to vector<96xf32>
    %6 = vector.shape_cast %5 : vector<96xf32> to vector<1x96xf32>
    %7 = vector.broadcast %6 : vector<1x96xf32> to vector<16x96xf32>
    %8 = arith.addf %3, %7 : vector<16x96xf32>
    %9 = vector.shape_cast %8 : vector<16x96xf32> to vector<2x8x96xf32>
    %c0_6 = arith.constant 0 : index
    %c0_7 = arith.constant 0 : index
    %c0_8 = arith.constant 0 : index
    %10 = vector.load %arg2[%c0_6, %c0_7, %c0_8] : memref<2x8x8xbf16, #tpu.memory_space<vmem>>, vector<2x8x8xbf16>
    %11 = arith.extf %10 : vector<2x8x8xbf16> to vector<2x8x8xf32>
    %cst_9 = arith.constant 1.000000e+00 : f32
    %12 = vector.broadcast %cst_9 : f32 to vector<2x8x8xf32>
    %13 = arith.subf %12, %11 : vector<2x8x8xf32>
    %cst_10 = arith.constant -1.000000e+07 : f32
    %14 = vector.broadcast %cst_10 : f32 to vector<2x8x8xf32>
    %15 = arith.mulf %13, %14 : vector<2x8x8xf32>
    %16 = vector.extract_strided_slice %9 {offsets = [0, 0, 0], sizes = [2, 8, 16], strides = [1, 1, 1]} : vector<2x8x96xf32> to vector<2x8x16xf32>
    %cst_11 = arith.constant 2.500000e-01 : f32
    %17 = vector.broadcast %cst_11 : f32 to vector<2x8x16xf32>
    %18 = arith.mulf %16, %17 : vector<2x8x16xf32>
    %19 = vector.extract_strided_slice %9 {offsets = [0, 0, 32], sizes = [2, 8, 16], strides = [1, 1, 1]} : vector<2x8x96xf32> to vector<2x8x16xf32>
    %20 = vector.extract_strided_slice %9 {offsets = [0, 0, 64], sizes = [2, 8, 16], strides = [1, 1, 1]} : vector<2x8x96xf32> to vector<2x8x16xf32>
    %cst_12 = arith.constant dense<0.000000e+00> : vector<2x8x8xf32>
    %21 = tpu.matmul %18, %19, %cst_12 {dimension_numbers = #tpu.dot_dimension_numbers<[2], [2], [1], [1], [0, 0, 0, 1, 1, 1], [0], [0]>} : vector<2x8x16xf32>, vector<2x8x16xf32>, vector<2x8x8xf32> -> vector<2x8x8xf32>
    %22 = arith.addf %21, %15 : vector<2x8x8xf32>
    %cst_13 = arith.constant dense<0xFF800000> : vector<2x8xf32>
    %23 = vector.multi_reduction <maximumf>, %22, %cst_13 [2] : vector<2x8x8xf32> to vector<2x8xf32>
    %24 = vector.shape_cast %23 : vector<2x8xf32> to vector<2x8x1xf32>
    %25 = vector.broadcast %24 : vector<2x8x1xf32> to vector<2x8x8xf32>
    %26 = arith.subf %22, %25 : vector<2x8x8xf32>
    %27 = math.exp %26 : vector<2x8x8xf32>
    %cst_14 = arith.constant dense<0.000000e+00> : vector<2x8xf32>
    %28 = vector.multi_reduction <add>, %27, %cst_14 [2] : vector<2x8x8xf32> to vector<2x8xf32>
    %29 = vector.shape_cast %28 : vector<2x8xf32> to vector<2x8x1xf32>
    %30 = tpu.reciprocal %29 {approx = true} : vector<2x8x1xf32> -> vector<2x8x1xf32>
    %31 = vector.broadcast %30 : vector<2x8x1xf32> to vector<2x8x8xf32>
    %32 = arith.mulf %27, %31 : vector<2x8x8xf32>
    %cst_15 = arith.constant dense<0.000000e+00> : vector<2x8x16xf32>
    %33 = tpu.matmul %32, %20, %cst_15 {dimension_numbers = #tpu.dot_dimension_numbers<[2], [1], [1], [2], [0, 0, 0, 1, 1, 2], [0], [0]>} : vector<2x8x8xf32>, vector<2x8x16xf32>, vector<2x8x16xf32> -> vector<2x8x16xf32>
    %cst_16 = arith.constant dense<0xFF800000> : vector<2x16xf32>
    %34 = vector.multi_reduction <maximumf>, %33, %cst_16 [1] : vector<2x8x16xf32> to vector<2x16xf32>
    %c0_17 = arith.constant 0 : index
    %c0_18 = arith.constant 0 : index
    %35 = vector.load %arg5[%c0_17, %c0_18] : memref<2x32xf32, #tpu.memory_space<vmem>>, vector<2x16xf32>
    tpu.vector_store %arg5[%c0_17, %c0_18], %34 {strides = array<i32>} : memref<2x32xf32, #tpu.memory_space<vmem>>, vector<2x16xf32>,
    %36 = vector.extract_strided_slice %9 {offsets = [0, 0, 16], sizes = [2, 8, 16], strides = [1, 1, 1]} : vector<2x8x96xf32> to vector<2x8x16xf32>
    %cst_19 = arith.constant 2.500000e-01 : f32
    %37 = vector.broadcast %cst_19 : f32 to vector<2x8x16xf32>
    %38 = arith.mulf %36, %37 : vector<2x8x16xf32>
    %39 = vector.extract_strided_slice %9 {offsets = [0, 0, 48], sizes = [2, 8, 16], strides = [1, 1, 1]} : vector<2x8x96xf32> to vector<2x8x16xf32>
    %40 = vector.extract_strided_slice %9 {offsets = [0, 0, 80], sizes = [2, 8, 16], strides = [1, 1, 1]} : vector<2x8x96xf32> to vector<2x8x16xf32>
    %cst_20 = arith.constant dense<0.000000e+00> : vector<2x8x8xf32>
    %41 = tpu.matmul %38, %39, %cst_20 {dimension_numbers = #tpu.dot_dimension_numbers<[2], [2], [1], [1], [0, 0, 0, 1, 1, 1], [0], [0]>} : vector<2x8x16xf32>, vector<2x8x16xf32>, vector<2x8x8xf32> -> vector<2x8x8xf32>
    %42 = arith.addf %41, %15 : vector<2x8x8xf32>
    %cst_21 = arith.constant dense<0xFF800000> : vector<2x8xf32>
    %43 = vector.multi_reduction <maximumf>, %42, %cst_21 [2] : vector<2x8x8xf32> to vector<2x8xf32>
    %44 = vector.shape_cast %43 : vector<2x8xf32> to vector<2x8x1xf32>
    %45 = vector.broadcast %44 : vector<2x8x1xf32> to vector<2x8x8xf32>
    %46 = arith.subf %42, %45 : vector<2x8x8xf32>
    %47 = math.exp %46 : vector<2x8x8xf32>
    %cst_22 = arith.constant dense<0.000000e+00> : vector<2x8xf32>
    %48 = vector.multi_reduction <add>, %47, %cst_22 [2] : vector<2x8x8xf32> to vector<2x8xf32>
    %49 = vector.shape_cast %48 : vector<2x8xf32> to vector<2x8x1xf32>
    %50 = tpu.reciprocal %49 {approx = true} : vector<2x8x1xf32> -> vector<2x8x1xf32>
    %51 = vector.broadcast %50 : vector<2x8x1xf32> to vector<2x8x8xf32>
    %52 = arith.mulf %47, %51 : vector<2x8x8xf32>
    %cst_23 = arith.constant dense<0.000000e+00> : vector<2x8x16xf32>
    %53 = tpu.matmul %52, %40, %cst_23 {dimension_numbers = #tpu.dot_dimension_numbers<[2], [1], [1], [2], [0, 0, 0, 1, 1, 2], [0], [0]>} : vector<2x8x8xf32>, vector<2x8x16xf32>, vector<2x8x16xf32> -> vector<2x8x16xf32>
    %cst_24 = arith.constant dense<0xFF800000> : vector<2x16xf32>
    %54 = vector.multi_reduction <maximumf>, %53, %cst_24 [1] : vector<2x8x16xf32> to vector<2x16xf32>
    %c0_25 = arith.constant 0 : index
    %c16 = arith.constant 16 : index
    %55 = vector.load %arg5[%c0_25, %c16] : memref<2x32xf32, #tpu.memory_space<vmem>>, vector<2x16xf32>
    tpu.vector_store %arg5[%c0_25, %c16], %54 {strides = array<i32>} : memref<2x32xf32, #tpu.memory_space<vmem>>, vector<2x16xf32>,
    return
  }
  func.func @transform_0(%arg0: i32) -> (i32, i32, i32) {
    %c0_i32 = arith.constant 0 : i32
    %c0_i32_0 = arith.constant 0 : i32
    %c0_i32_1 = arith.constant 0 : i32
    return %arg0, %c0_i32, %c0_i32_0 : i32, i32, i32
  }
  func.func @transform_1(%arg0: i32) -> (i32, i32, i32) {
    %c0_i32 = arith.constant 0 : i32
    %c0_i32_0 = arith.constant 0 : i32
    %c0_i32_1 = arith.constant 0 : i32
    return %arg0, %c0_i32, %c0_i32_0 : i32, i32, i32
  }
  func.func @transform_2(%arg0: i32) -> (i32, i32) {
    %c0_i32 = arith.constant 0 : i32
    %c0_i32_0 = arith.constant 0 : i32
    %c0_i32_1 = arith.constant 0 : i32
    return %c0_i32, %c0_i32_0 : i32, i32
  }
  func.func @transform_3(%arg0: i32) -> (i32, i32) {
    %c0_i32 = arith.constant 0 : i32
    %c0_i32_0 = arith.constant 0 : i32
    %c0_i32_1 = arith.constant 0 : i32
    return %c0_i32, %c0_i32_0 : i32, i32
  }
  func.func @transform_4(%arg0: i32) -> (i32, i32) {
    %c0_i32 = arith.constant 0 : i32
    %c0_i32_0 = arith.constant 0 : i32
    return %arg0, %c0_i32 : i32, i32
  }
}

</mosaic_0001>

<bundles_post_ra>
// kernel: tpu_custom_call.1
= control target key start
LH: loop header
LB: loop body
LE: loop exit
PB: predicated region body
PF: predicated region fallthrough
CT: control target
= control target key end

     0   :  { %9 = vsyncpa [#allocation3], 0  ;;  %s689_s0 = inlined_call_operand.hbm [shape: f32[2,8,32], index: 0, kind: input, shape index: {}]   ;;  %s690_s1 = inlined_call_operand.hbm [shape: bf16[2,8,8], index: 1, kind: input, shape index: {}]   ;;  %s691_s2 = inlined_call_operand.hbm [shape: f32[32,96], index: 2, kind: input, shape index: {}]   ;;  %s692_s3 = inlined_call_operand.vmem [shape: f32[1,96], index: 3, kind: input, shape index: {}]   ;;  %s693_s4 = inlined_call_operand.hbm [shape: f32[2,32], index: 4, kind: output, shape index: {}]  }
   0x1   :  { %10 = vsyncpa [#allocation6], 0  ;;  %s29_s17 = sshll.u32 %s690_s1, 4  ;;  %s30_s17 = int_to_ptr.hbm [resolvable:$true] %s29_s17 }
   0x2   :  { %11 = vsyncpa [#allocation4], 0  ;;  %s593_s18 = smov [#allocation5]   ;;  %s16_s22 = sshll.u32 %s689_s0, 4  ;;  %s17_s22 = int_to_ptr.hbm [resolvable:$true] %s16_s22 }
   0x3   :  { %s31_s19 = sshll.u32 %s593_s18, 4  ;;  %s594_s23 = smov 64   ;;  %s32_s19 = int_to_ptr.vmem [resolvable:$true] %s31_s19 }
   0x4   :  { %s595_s24 = smov 4   ;;  %s596_s25 = smov [#allocation2]  }
   0x5   :  { %37 = dma.hbm_to_vmem [thread:$0]  %s30_s17, 128, %s32_s19, [#allocation6], %s594_s23, %s594_s23, %s595_s24  }
   0x6   :  { %s18_s26 = sshll.u32 %s596_s25, 4  ;;  %s597_s27 = smov 128   ;;  %s19_s26 = int_to_ptr.vmem [resolvable:$true] %s18_s26 }
   0x7   :  { %s598_s1 = smov 8   ;;  %s42_s30 = sshll.u32 %s691_s2, 4  ;;  %s43_s30 = int_to_ptr.hbm [resolvable:$true] %s42_s30 }
   0x8   :  { %24 = dma.hbm_to_vmem [thread:$0]  %s17_s22, 256, %s19_s26, [#allocation3], %s597_s27, %s597_s27, %s598_s1  }
   0x9   :  { %s599_s5 = smov [#allocation7]  }
   0xa   :  { %s44_s6 = sshll.u32 %s599_s5, 4  ;;  %s45_s6 = int_to_ptr.vmem [resolvable:$true] %s44_s6 }
   0xb   :  { %50 = dma.hbm_to_vmem [thread:$0]  %s43_s30, 512, %s45_s6, [#allocation6], %s597_s27, %s597_s27, %s598_s1  }
   0xc   :  { %587 = dma.done.wait [#allocation3], 256  }
   0xd   :  { %588 = vsyncadd [#allocation3], 4294967040 }
   0xe   :  { %589 = dma.done.wait [#allocation6], 640  }
   0xf   :  { %590 = vsyncadd [#allocation6], 4294966656  ;;  %v70_v0 = vld [vmem:[#allocation7 + $0x18] sm:$0xff]  ;;  %v69_v1 = vld [vmem:[#allocation7 + $0x10] sm:$0xff]  ;;  %vm75_vm0 = vcmask 261120   ;;  %s600_s7 = smov 80  }
  0x10   :  { %94 = vmatpush.msra.mxu0 %v70_v0  ;;  %v68_v2 = vld [vmem:[#allocation7 + $0x8] sm:$0xff]  ;;  %v67_v3 = vld [vmem:[#allocation7] sm:$0xff]  ;;  %v66_v5 = vld [vmem:[#allocation2 + $0x8] sm:$0xff]  ;;  %s601_s8 = smov 96   ;;  %s602_s9 = smov 112   ;;  %vm118_vm1 = vcmask 130048  }
  0x11   :  { %v65_v4 = vld [vmem:[#allocation2] sm:$0xff]  ;;  %v453_v19 = vld [vmem:[#allocation5] sm:$0xff]   ;;  %vm172_vm2 = vcmask 64512   ;;  %vm263_vm3 = vcmask 1041409   ;;  %vm266_vm4 = vcmask 123904   ;;  %s604_s10 = smov 16  }
  0x12   :  { %95 = vmatpush.msra.mxu0 %v69_v1  ;;  %v474_v6 = vld [vmem:[%s692_s3] ss:$0 sm:$0xff]  ;;  %v454_v20 = vunpack.c.l.bf16 %v453_v19  ;;  %v455_v26 = vunpack.c.h.bf16 %v453_v19  ;;  %s603_s3 = smov 48   ;;  %s605_s11 = smov [#allocation8]   ;;  %vm418_vm5 = vcmask 255104  }
  0x13   :  { %s425_s12 = sshll.u32 %s605_s11, 4  ;;  %s427_s15 = sshll.u32 %s693_s4, 4  ;;  %s426_s12 = int_to_ptr.vmem [resolvable:$true] %s425_s12  ;;  %s428_s15 = int_to_ptr.hbm [resolvable:$true] %s427_s15 }
  0x14   :  { %96 = vmatpush.msra.mxu0 %v68_v2  ;;  %v109_v21 = vsub.f32 1.0, %v454_v20  ;;  %v110_v27 = vsub.f32 1.0, %v455_v26 }
  0x16   :  { %97 = vmatpush.msra.mxu0 %v67_v3  ;;  %v111_v22 = vmul.f32 -10000000.0, %v109_v21  ;;  %v112_v31 = vmul.f32 -10000000.0, %v110_v27 }
  0x17   :  { %438 = vmatmul.msk.f32.vlgmr.msra.gmra.mxu0 %vm75_vm0, %v65_v4 }
  0x1f   :  { %439 = vmatmul.msk.f32.gmra.mxu0 %vm75_vm0, %v66_v5 }
  0x94   :  { %v99_v7 = vpop.f32.mrf.mxu0 }
  0x95   :  { %v645_v8 = vadd.f32 %v474_v6, %v99_v7 }
  0x97   :  { %270 = vrot.lane.b32.xlu1 %v645_v8, %s600_s7  ;;  %116 = vrot.lane.b32.xlu0 %v645_v8, %s601_s8  ;;  %v113_v9 = vmul.f32 0.25, %v645_v8 }
  0x99   :  { %268 = vrot.lane.b32.xlu2 %v113_v9, %s602_s9 }
  0x9c   :  { %v102_v10 = vpop.f32.mrf.mxu0 }
  0x9d   :  { %v650_v11 = vadd.f32 %v474_v6, %v102_v10 }
  0x9f   :  { %298 = vrot.lane.b32.xlu1 %v650_v11, %s600_s7  ;;  %145 = vrot.lane.b32.xlu0 %v650_v11, %s601_s8  ;;  %v114_v12 = vmul.f32 0.25, %v650_v11  ;;  %v469_v38 = vpack.i.bf16 %v650_v11, %v645_v8 }
  0xa1   :  { %296 = vrot.lane.b32.xlu2 %v114_v12, %s602_s9 }
  0xf3   :  { %v269_v17 = vpop.permute.xlu2 %268 }
  0xfb   :  { %v297_v18 = vpop.permute.xlu2 %296 }
 0x109   :  { %v271_v13 = vpop.permute.xlu1 %270  ;;  %v117_v14 = vpop.permute.xlu0 %116 }
 0x10a   :  { %440 = vmatpush.xpose.msk.msra.mxu1 %vm118_vm1, %v117_v14 }
 0x10d   :  { %441 = vmatmul.msk.f32.vlgmr.msra.gmra.mxu1 %vm118_vm1, %v113_v9 }
 0x10e   :  { %446 = vmatpush.xpose.msk.msrb.mxu1 %vm118_vm1, %v271_v13 }
 0x111   :  { %v299_v15 = vpop.permute.xlu1 %298  ;;  %v146_v16 = vpop.permute.xlu0 %145 }
 0x112   :  { %442 = vmatpush.xpose.msk.msra.mxu2 %vm118_vm1, %v146_v16 }
 0x115   :  { %443 = vmatmul.msk.f32.vlgmr.msra.gmra.mxu2 %vm118_vm1, %v114_v12  ;;  %447 = vmatmul.msk.f32.vlgmr.msrb.gmra.mxu1 %vm118_vm1, %v269_v17 }
 0x116   :  { %448 = vmatpush.xpose.msk.msrb.mxu2 %vm118_vm1, %v299_v15 }
 0x11d   :  { %449 = vmatmul.msk.f32.vlgmr.msrb.gmra.mxu2 %vm118_vm1, %v297_v18 }
 0x18a   :  { %v141_v23 = vpop.f32.mrf.mxu1 }
 0x18b   :  { %v142_v24 = vadd.f32 %v141_v23, %v111_v22 }
 0x18d   :  { %v173_v25 = vsel %vm172_vm2, %v142_v24, -inf }
 0x18e   :  { %174 = vmax.xlane.f32.xlu0 %v173_v25 }
 0x192   :  { %v293_v28 = vpop.f32.mrf.mxu1 }
 0x193   :  { %v294_v29 = vadd.f32 %v293_v28, %v111_v22 }
 0x195   :  { %v324_v30 = vsel %vm172_vm2, %v294_v29, -inf }
 0x196   :  { %325 = vmax.xlane.f32.xlu2 %v324_v30 }
 0x198   :  { %v169_v32 = vpop.f32.mrf.mxu2 }
 0x199   :  { %v170_v33 = vadd.f32 %v169_v32, %v112_v31 }
 0x19b   :  { %v176_v34 = vsel %vm172_vm2, %v170_v33, -inf }
 0x19c   :  { %177 = vmax.xlane.f32.xlu1 %v176_v34 }
 0x1a0   :  { %v321_v35 = vpop.f32.mrf.mxu2 }
 0x1a1   :  { %v322_v36 = vadd.f32 %v321_v35, %v112_v31 }
 0x1a3   :  { %v327_v37 = vsel %vm172_vm2, %v322_v36, -inf }
 0x1a4   :  { %328 = vmax.xlane.f32.xlu2 %v327_v37 }
 0x1bc   :  { %470 = vrot.lane.b32.xlu2 %v469_v38, %s594_s23 }
 0x201   :  { %v175_v39 = vpop.xlane.xlu0 %174 }
 0x202   :  { %v179_v40 = vsub.f32 %v142_v24, %v175_v39 }
 0x204   :  { %v181_v41 = vmul.f32 1.442695, %v179_v40 }
 0x206   :  { %475 = vpow2.f32 %v181_v41 }
 0x209   :  { %v326_v42 = vpop.xlane.xlu2 %325 }
 0x20a   :  { %v330_v43 = vsub.f32 %v294_v29, %v326_v42 }
 0x20c   :  { %v476_v44 = vpop.eup %475  ;;  %v332_v45 = vmul.f32 1.442695, %v330_v43 }
 0x20d   :  { %v185_v46 = vsel %vm172_vm2, %v476_v44, 0.0 }
 0x20e   :  { %477 = vpow2.f32 %v332_v45  ;;  %186 = vadd.xlane.f32.xlu0 %v185_v46 }
 0x20f   :  { %v178_v47 = vpop.xlane.xlu1 %177 }
 0x210   :  { %v180_v48 = vsub.f32 %v170_v33, %v178_v47 }
 0x212   :  { %v183_v49 = vmul.f32 1.442695, %v180_v48 }
 0x214   :  { %v478_v50 = vpop.eup %477  ;;  %479 = vpow2.f32 %v183_v49 }
 0x215   :  { %v336_v51 = vsel %vm172_vm2, %v478_v50, 0.0 }
 0x216   :  { %337 = vadd.xlane.f32.xlu0 %v336_v51 }
 0x217   :  { %v329_v52 = vpop.xlane.xlu2 %328 }
 0x218   :  { %v331_v53 = vsub.f32 %v322_v36, %v329_v52 }
 0x21a   :  { %v480_v54 = vpop.eup %479  ;;  %v334_v55 = vmul.f32 1.442695, %v331_v53 }
 0x21b   :  { %v188_v56 = vsel %vm172_vm2, %v480_v54, 0.0 }
 0x21c   :  { %481 = vpow2.f32 %v334_v55  ;;  %189 = vadd.xlane.f32.xlu1 %v188_v56 }
 0x21f   :  { %v471_v57 = vpop.permute.xlu2 %470 }
 0x220   :  { %v472_v58 = vunpack.i.l.bf16 %v471_v57  ;;  %v473_v59 = vunpack.i.h.bf16 %v471_v57 }
 0x222   :  { %v482_v60 = vpop.eup %481  ;;  %216 = vmatpush.msra.mxu3 %v472_v58 }
 0x223   :  { %v339_v61 = vsel %vm172_vm2, %v482_v60, 0.0 }
 0x224   :  { %242 = vmatpush.msrb.mxu3 %v473_v59  ;;  %340 = vadd.xlane.f32.xlu1 %v339_v61 }
 0x22a   :  { %346 = vrot.lane.b32.xlu0 %v645_v8, %s603_s3 }
 0x23d   :  { %372 = vrot.lane.b32.xlu1 %v650_v11, %s603_s3 }
 0x281   :  { %v187_v62 = vpop.xlane.xlu0 %186 }
 0x282   :  { %483 = vrcp.f32 %v187_v62 }
 0x288   :  { %v484_v63 = vpop.eup %483 }
 0x289   :  { %v193_v0 = vmul.f32 %v484_v63, %v476_v44  ;;  %v338_v2 = vpop.xlane.xlu0 %337 }
 0x28b   :  { %444 = vmatmul.msk.f32.vlgmr.msra.gmra.mxu3 %vm172_vm2, %v193_v0 }
 0x28f   :  { %v190_v1 = vpop.xlane.xlu1 %189 }
 0x290   :  { %485 = vrcp.f32 %v190_v1 }
 0x291   :  { %487 = vrcp.f32 %v338_v2 }
 0x296   :  { %v486_v3 = vpop.eup %485 }
 0x297   :  { %v194_v4 = vmul.f32 %v486_v3, %v480_v54  ;;  %v488_v5 = vpop.eup %487  ;;  %v341_v8 = vpop.xlane.xlu1 %340 }
 0x298   :  { %v344_v7 = vmul.f32 %v488_v5, %v478_v50  ;;  %489 = vrcp.f32 %v341_v8 }
 0x299   :  { %445 = vmatmul.msk.f32.vlgmr.msrb.gmra.mxu3 %vm172_vm2, %v194_v4 }
 0x29c   :  { %v347_v6 = vpop.permute.xlu0 %346 }
 0x29d   :  { %367 = vmatpush.msra.mxu3 %v347_v6 }
 0x29e   :  { %v490_v9 = vpop.eup %489 }
 0x29f   :  { %v345_v10 = vmul.f32 %v490_v9, %v482_v60 }
 0x2a1   :  { %450 = vmatmul.msk.f32.vlgmr.msra.gmra.mxu3 %vm172_vm2, %v344_v7 }
 0x2af   :  { %v373_v11 = vpop.permute.xlu1 %372 }
 0x2b0   :  { %393 = vmatpush.msra.mxu1 %v373_v11 }
 0x2b1   :  { %451 = vmatmul.msk.f32.vlgmr.msra.gmra.mxu1 %vm172_vm2, %v345_v10 }
 0x30e   :  { %v218_v12 = vpop.f32.mrf.mxu3 }
 0x30f   :  { %v247_v13 = vsel %vm118_vm1, %v218_v12, -inf }
 0x310   :  { %v248_v14 = vrot.slane %v247_v13, 4 }
 0x312   :  { %v249_v15 = vmax.f32 %v247_v13, %v248_v14 }
 0x314   :  { %v250_v16 = vrot.slane %v249_v15, 2 }
 0x316   :  { %v251_v20 = vmax.f32 %v249_v15, %v250_v16 }
 0x318   :  { %v252_v23 = vrot.slane %v251_v20, 1 }
 0x31a   :  { %v253_v29 = vmax.f32 %v251_v20, %v252_v23 }
 0x31c   :  { %v244_v17 = vpop.f32.mrf.mxu3 }
 0x31d   :  { %v254_v18 = vsel %vm118_vm1, %v244_v17, -inf }
 0x31e   :  { %v255_v19 = vrot.slane %v254_v18, 4 }
 0x320   :  { %v256_v21 = vmax.f32 %v254_v18, %v255_v19 }
 0x322   :  { %v257_v22 = vrot.slane %v256_v21, 2 }
 0x324   :  { %v258_v24 = vmax.f32 %v256_v21, %v257_v22  ;;  %v369_v25 = vpop.f32.mrf.mxu3 }
 0x325   :  { %v398_v26 = vsel %vm118_vm1, %v369_v25, -inf }
 0x326   :  { %v259_v27 = vrot.slane %v258_v24, 1  ;;  %v399_v28 = vrot.slane %v398_v26, 4 }
 0x328   :  { %v260_v30 = vmax.f32 %v258_v24, %v259_v27  ;;  %v400_v31 = vmax.f32 %v398_v26, %v399_v28 }
 0x32a   :  { %v264_v32 = vsel %vm263_vm3, %v260_v30, %v253_v29  ;;  %v401_v33 = vrot.slane %v400_v31, 2 }
 0x32b   :  { %267 = vst.msk [vmem:[#allocation8] sm:$0x3] %vm266_vm4, %v264_v32 }
 0x32c   :  { %v402_v37 = vmax.f32 %v400_v31, %v401_v33 }
 0x32e   :  { %v395_v34 = vpop.f32.mrf.mxu1  ;;  %v403_v40 = vrot.slane %v402_v37, 1 }
 0x32f   :  { %v405_v35 = vsel %vm118_vm1, %v395_v34, -inf }
 0x330   :  { %v406_v36 = vrot.slane %v405_v35, 4  ;;  %v404_v43 = vmax.f32 %v402_v37, %v403_v40 }
 0x332   :  { %v407_v38 = vmax.f32 %v405_v35, %v406_v36 }
 0x334   :  { %v408_v39 = vrot.slane %v407_v38, 2 }
 0x336   :  { %v409_v41 = vmax.f32 %v407_v38, %v408_v39 }
 0x338   :  { %v410_v42 = vrot.slane %v409_v41, 1 }
 0x33a   :  { %v411_v44 = vmax.f32 %v409_v41, %v410_v42 }
 0x33c   :  { %v414_v45 = vsel %vm263_vm3, %v411_v44, %v404_v43 }
 0x33d   :  { %415 = vrot.lane.b32.xlu2 %v414_v45, %s604_s10 }
 0x397   :  { %v416_v46 = vpop.permute.xlu2 %415 }
 0x398   :  { %419 = vst.msk [vmem:[#allocation8] sm:$0x3] %vm418_vm5, %v416_v46 }
 0x399   :  { %430 = dma.vmem_to_hbm [thread:$0]  %s426_s12, 32, %s428_s15, [#allocation4]  }
 0x39a   :  { %591 = dma.done.wait [#allocation4], 32  }
 0x39b   :  { %592 = vsyncadd [#allocation4], 4294967264 }
 0x39c   :  { %435 = vsyncpa [#allocation3], 1 }
 0x39d   :  { %436 = vsyncpa [#allocation6], 1 }
 0x39e   :  { %437 = vsyncpa [#allocation4], 1 }

</bundles_post_ra>
